<compile_context>
chip_gen: v7x
topology: tpu7x:2x2x1
jax: 0.10.0
libtpu: 0.0.40
codegen_flags: <defaults>
</compile_context>

<pallas_src>
from types import SimpleNamespace

import numpy as np

import jax
import jax.numpy as jnp
from jax.experimental import pallas as pl
from jax.experimental.pallas import tpu as pltpu

# ---------------------------------------------------------------------------
# Config (mirrors cfg.MODEL.* of the PyTorch module, at small synthetic sizes)
# ---------------------------------------------------------------------------
NUM_CLASSES = 4          # cfg.MODEL.NUM_CLASSES
EMB_SIZE = 32            # cfg.MODEL.EMB_SIZE
PATCH_SIZE = 4           # cfg.MODEL.PATCH_SIZE (synthetic backbone patch)
MAX_K = 8                # cfg.MODEL.MAX_K  (clusters per class)
NP_SLOPE = 0.5           # dist2sim_ slope from train_n_p_task
NORMALIZE_DIST_BY_TAU = True   # cfg.MODEL.TAU_NORM

# Row layout of the fused weight matrix W_big^T (rows = outputs of the single
# matmul): [emb (EMB) | logits (C) | pad to 8 | -2/tau-scaled clusters (K*C)].
LOGITS_ROW = EMB_SIZE
CROSS_ROW = ((EMB_SIZE + NUM_CLASSES + 7) // 8) * 8
W_ROWS = CROSS_ROW + MAX_K * NUM_CLASSES

# Max tokens (lanes) per grid step.  Per-tile VMEM at 1024 tokens:
# ~0.25 MiB input block (double-buffered ~0.5 MiB) + <0.2 MiB outputs +
# ~1 MiB intermediates — far under the scoped-VMEM default on v5e/v6e/v7x.
TOKEN_TILE = 1024


def _round_up(a, b):
    return ((a + b - 1) // b) * b


def _cdiv(a, b):
    return -(-a // b)


def _choose_tiling(n):
    """Token tile size (multiple of 128) and padded token count.

    Always >= 2 grid steps so the single "parallel" grid axis can shard across
    v7x's two TensorCores; the tile adapts to n so padding waste stays small.
    """
    n128 = _round_up(max(n, 1), 128)
    steps = max(2, _cdiv(n128, TOKEN_TILE))
    tm = _round_up(_cdiv(n128, steps), 128)
    return tm, steps * tm


# ---------------------------------------------------------------------------
# Fused kernel: synthetic backbone + GROOD head, tokens on lanes.
#
#   emb      = W_emb^T @ x_patch                      (synthetic backbone)
#   logits   = (W_emb W_head)^T @ x_patch
#   nm_dist[c] = min_k ||emb - mu_{c,k}|| / sqrt(var_{c,k})   (knn_dist_min)
#   sim      = 1 / (1 + 0.5 * nm_dist)                (dist2sim_)
#   score    = sigmoid(w0 * softmax(logits) + w1 * sim + b)   per class
#   pred_y   = argmax(logits); pred_score = score[pred_y]
#
# TODO(synk): real module uses a frozen DINOv2 ViT-L loaded from checkpoint;
#             replaced by a linear patch embedding since weights cannot be
#             loaded in-script.
# TODO(synk): eval_neyman_pearson_task / OnlineKMeans._dist_fnc sources are
#             not provided; a per-class linear+sigmoid N-P model and
#             tau-normalised Euclidean distance are used as documented
#             stand-ins.
# ---------------------------------------------------------------------------
def grood_fused_kernel(patches_ref, w_big_ref, knm_ref, np_ref,
                       logits_ref, nm_ref, score_ref, pred_y_ref,
                       pred_score_ref):
    c_num = NUM_CLASSES
    k_num = MAX_K

    # ---- ONE fused MXU matmul: emb / logits / cluster cross-term ----------
    # patches_ref is (FEAT, TM): tokens on lanes, so every row below is a
    # lane-dense per-token vector.
    big = jnp.dot(w_big_ref[...], patches_ref[...],
                  preferred_element_type=jnp.float32)          # (W_ROWS, TM)

    emb = big[0:EMB_SIZE, :]                                   # (EMB, TM)
    logits = big[LOGITS_ROW:LOGITS_ROW + c_num, :]             # (C, TM)
    cross = big[CROSS_ROW:CROSS_ROW + k_num * c_num, :]        # (K*C, TM)
    # NOTE: real module slices out.emb[..., -EMB_SIZE:]; the synthetic
    # backbone output width equals EMB_SIZE so the slice is the identity here.

    # ---- per-class nearest-cluster tau-normalised distance ----------------
    # d2[j] = (|e|^2 + |mu_j|^2 - 2 e.mu_j) / tau_j; the -2/tau_j is already
    # folded into the matmul rows (cross) and |mu_j|^2/tau_j precomputed.
    emb_sq = jnp.sum(emb * emb, axis=0, keepdims=True)         # (1, TM)
    inv_tau = knm_ref[:, 0:1]                                  # (K*C, 1)
    mu_bias = knm_ref[:, 1:2]                                  # (K*C, 1)
    d2 = inv_tau * emb_sq + mu_bias + cross                    # (K*C, TM)

    # Segmented min over K (rows are k-major: row = k*C + c): log2(K)-step
    # tree (generic leftover loop only triggers if MAX_K is not a power of 2).
    m = d2
    rows = k_num * c_num
    while rows > c_num and rows % (2 * c_num) == 0:
        half = rows // 2
        m = jnp.minimum(m[:half, :], m[half:rows, :])
        rows = half
    min_d2 = m[0:c_num, :]
    for k in range(1, rows // c_num):
        min_d2 = jnp.minimum(min_d2, m[k * c_num:(k + 1) * c_num, :])
    nm_dist = jnp.sqrt(jnp.maximum(min_d2, 0.0))               # (C, TM)

    # ---- Neyman-Pearson scoring (dist2sim_ + per-class linear + sigmoid) ---
    mx = jnp.max(logits, axis=0, keepdims=True)                # (1, TM)
    e = jnp.exp(logits - mx)
    probs = e / jnp.sum(e, axis=0, keepdims=True)              # (C, TM)
    sim = 1.0 / (1.0 + NP_SLOPE * nm_dist)                     # (C, TM)
    z = np_ref[:, 0:1] * probs + np_ref[:, 1:2] * sim + np_ref[:, 2:3]
    score = 1.0 / (1.0 + jnp.exp(-z))                          # (C, TM)

    # ---- argmax over logits (first-max index) + gather of its score --------
    n_tok = logits.shape[1]
    cls_iota = jax.lax.broadcasted_iota(jnp.int32, (c_num, n_tok), 0)
    is_max = logits >= mx
    pred_y = jnp.min(jnp.where(is_max, cls_iota, c_num),
                     axis=0, keepdims=True)                    # (1, TM) int32
    onehot = (cls_iota == pred_y).astype(jnp.float32)
    pred_score = jnp.sum(score * onehot, axis=0, keepdims=True)  # (1, TM)

    # ---- every output written exactly once, full-lane-width stores ---------
    logits_ref[...] = logits
    nm_ref[...] = nm_dist
    score_ref[...] = score
    pred_y_ref[...] = pred_y.astype(jnp.float32)
    pred_score_ref[...] = pred_score


def run_grood_fused(patches_t, w_big_t, knm, np_t, tm):
    feat, n_pad = patches_t.shape
    c = NUM_CLASSES
    kc = MAX_K * NUM_CLASSES
    grid = (n_pad // tm,)

    flops = 2 * n_pad * W_ROWS * feat + 80 * n_pad
    transcendentals = 3 * c * n_pad            # softmax exp, sqrt, sigmoid exp
    bytes_accessed = 4 * (n_pad * feat + n_pad * (3 * c + 2)
                          + W_ROWS * feat + 2 * kc + 3 * c)

    def const(i):
        return (0, 0)

    def tok(i):
        return (0, i)

    out_shape = (
        jax.ShapeDtypeStruct((c, n_pad), jnp.float32),   # logits^T
        jax.ShapeDtypeStruct((c, n_pad), jnp.float32),   # nm_dist^T
        jax.ShapeDtypeStruct((c, n_pad), jnp.float32),   # score^T
        jax.ShapeDtypeStruct((1, n_pad), jnp.float32),   # pred_y
        jax.ShapeDtypeStruct((1, n_pad), jnp.float32),   # pred_score
    )
    out_specs = (
        pl.BlockSpec((c, tm), tok),
        pl.BlockSpec((c, tm), tok),
        pl.BlockSpec((c, tm), tok),
        pl.BlockSpec((1, tm), tok),
        pl.BlockSpec((1, tm), tok),
    )

    return pl.pallas_call(
        grood_fused_kernel,
        grid=grid,
        in_specs=[
            pl.BlockSpec((feat, tm), tok),               # token tile (lanes)
            pl.BlockSpec(w_big_t.shape, const),          # VMEM-resident weights
            pl.BlockSpec(knm.shape, const),
            pl.BlockSpec(np_t.shape, const),
        ],
        out_specs=out_specs,
        out_shape=out_shape,
        compiler_params=pltpu.CompilerParams(
            dimension_semantics=("parallel",)),
        cost_estimate=pl.CostEstimate(
            flops=flops, transcendentals=transcendentals,
            bytes_accessed=bytes_accessed),
    )(patches_t, w_big_t, knm, np_t)


# ---------------------------------------------------------------------------
# Wrapper (glue): fold weights, patchify NCHW input (transposed so tokens land
# on lanes), pad tokens, call the fused kernel, reshape per-token outputs.
# ---------------------------------------------------------------------------
def _prepare_fused_weights(params):
    c, k, e = NUM_CLASSES, MAX_K, EMB_SIZE
    w_emb = params["w_emb"].astype(jnp.float32)              # (FEAT, EMB)
    w_head = params["w_head"].astype(jnp.float32)            # (EMB, C)
    feat = w_emb.shape[0]

    # clusters stored (C*K, EMB) with row = c*K + k (reference layout);
    # reorder to k-major rows (row = k*C + c) for the kernel's tree min.
    clusters = params["clusters"].reshape(c, k, e)
    clusters_kc = jnp.transpose(clusters, (1, 0, 2)).reshape(k * c, e)
    var_kc = jnp.transpose(params["cluster_var"]).reshape(k * c)
    inv_tau = (1.0 / var_kc if NORMALIZE_DIST_BY_TAU
               else jnp.ones_like(var_kc))                    # (K*C,)
    mu_sq = jnp.sum(clusters_kc * clusters_kc, axis=-1)       # (K*C,)
    knm = jnp.stack([inv_tau, mu_sq * inv_tau],
                    axis=-1).astype(jnp.float32)              # (K*C, 2)

    w_big_t = jnp.concatenate([
        jnp.transpose(w_emb),                                 # emb rows
        jnp.transpose(w_emb @ w_head),                        # logits rows
        jnp.zeros((CROSS_ROW - EMB_SIZE - c, feat), jnp.float32),
        (-2.0 * inv_tau)[:, None] * (clusters_kc @ jnp.transpose(w_emb)),
    ], axis=0).astype(jnp.float32)                            # (W_ROWS, FEAT)

    np_t = jnp.transpose(params["np_model"]).astype(jnp.float32)   # (C, 3)
    return w_big_t, knm, np_t


def grood_forward(x, params):
    b, cc, h, w = x.shape
    p = PATCH_SIZE
    hp, wp = h // p, w // p
    # NCHW -> (tokens, feat) -> transposed (feat, tokens): tokens on lanes.
    # TODO(synk): this patchify/transpose materialises one extra array in HBM;
    # an NHWC producer upstream (or the real ViT backbone) would avoid it.
    patches = x.reshape(b, cc, hp, p, wp, p).transpose(0, 2, 4, 1, 3, 5)
    patches = patches.reshape(b * hp * wp, cc * p * p).astype(jnp.float32)
    n = patches.shape[0]

    tm, n_pad = _choose_tiling(n)
    patches_t = jnp.pad(jnp.transpose(patches), ((0, 0), (0, n_pad - n)))

    # NOTE: bf16 inputs/weights would halve input HBM reads and double the MXU
    # rate, but are skipped to preserve 1e-4 parity with the f32 reference.
    w_big_t, knm, np_t = _prepare_fused_weights(params)

    logits_t, nm_t, score_t, pred_y_t, pred_s_t = run_grood_fused(
        patches_t, w_big_t, knm, np_t, tm)

    c = NUM_CLASSES
    logits = jnp.transpose(logits_t[:, :n])
    nm_dist = jnp.transpose(nm_t[:, :n])
    score = jnp.transpose(score_t[:, :n])
    pred_y = pred_y_t[0, :n]
    pred_score = pred_s_t[0, :n]

    return SimpleNamespace(
        pred_y=pred_y.reshape(b, hp, wp),
        pred_score=pred_score.reshape(b, hp, wp),
        pred_score_all=score.reshape(b, hp, wp, c),
        nm_dist=nm_dist.reshape(b, hp, wp, c),
        logits=logits.reshape(b, hp, wp, c),
    )


# ---------------------------------------------------------------------------
# Pure-JAX reference (same synthetic math) for correctness checking
# ---------------------------------------------------------------------------
def reference_forward(x, params):
    b, cc, h, w = x.shape
    p = PATCH_SIZE
    hp, wp = h // p, w // p
    patches = x.reshape(b, cc, hp, p, wp, p).transpose(0, 2, 4, 1, 3, 5)
    patches = patches.reshape(b * hp * wp, cc * p * p).astype(jnp.float32)

    emb = patches @ params["w_emb"]
    logits = emb @ params["w_head"]
    emb = emb[:, -EMB_SIZE:]

    clusters = params["clusters"].reshape(NUM_CLASSES, MAX_K, EMB_SIZE)
    diff = emb[:, None, None, :] - clusters[None, :, :, :]
    d = jnp.sqrt(jnp.maximum(jnp.sum(diff * diff, axis=-1), 0.0))
    if NORMALIZE_DIST_BY_TAU:
        d = d / jnp.sqrt(params["cluster_var"])[None, :, :]
    nm_dist = jnp.min(d, axis=-1)

    sim = 1.0 / (1.0 + NP_SLOPE * nm_dist)
    probs = jax.nn.softmax(logits, axis=-1)
    npm = params["np_model"]
    score = jax.nn.sigmoid(npm[0][None] * probs + npm[1][None] * sim
                           + npm[2][None])
    pred_y = jnp.argmax(logits, axis=-1)
    pred_score = score[jnp.arange(score.shape[0]), pred_y]
    return SimpleNamespace(
        pred_y=pred_y.astype(jnp.float32).reshape(b, hp, wp),
        pred_score=pred_score.reshape(b, hp, wp),
        pred_score_all=score.reshape(b, hp, wp, NUM_CLASSES),
        nm_dist=nm_dist.reshape(b, hp, wp, NUM_CLASSES),
        logits=logits.reshape(b, hp, wp, NUM_CLASSES),
    )


# ---------------------------------------------------------------------------
def init_params(key):
    k1, k2, k3, k4, k5 = jax.random.split(key, 5)
    feat = 4 * PATCH_SIZE * PATCH_SIZE          # in-channels * P * P
    w_emb = 0.05 * jax.random.normal(k1, (feat, EMB_SIZE), jnp.float32)
    w_head = 0.1 * jax.random.normal(k2, (EMB_SIZE, NUM_CLASSES), jnp.float32)
    clusters = jax.random.normal(
        k3, (NUM_CLASSES * MAX_K, EMB_SIZE), jnp.float32)
    cluster_var = jax.random.uniform(
        k4, (NUM_CLASSES, MAX_K), jnp.float32, minval=0.5, maxval=1.5)
    # synthetic per-class N-P model: rows = [w_logit, w_sim, bias]
    np_model = jnp.stack([
        4.0 + 0.1 * jax.random.normal(k5, (NUM_CLASSES,), jnp.float32),
        jnp.full((NUM_CLASSES,), 4.0, jnp.float32),
        jnp.full((NUM_CLASSES,), -4.0, jnp.float32),
    ], axis=0)
    return dict(w_emb=w_emb, w_head=w_head, clusters=clusters,
                cluster_var=cluster_var, np_model=np_model)


if __name__ == "__main__":
    key = jax.random.PRNGKey(0)
    kx, kp = jax.random.split(key)
    x = jax.random.normal(kx, (2, 4, 16, 16), jnp.float32)   # NCHW
    params = init_params(kp)

    out = grood_forward(x, params)
    jax.block_until_ready((out.pred_y, out.pred_score, out.pred_score_all,
                           out.nm_dist, out.logits))

    ref = reference_forward(x, params)
    np.testing.assert_allclose(np.asarray(out.logits), np.asarray(ref.logits),
                               rtol=1e-4, atol=1e-4)
    # nm_dist uses the expanded ||e||^2 + ||mu||^2 - 2 e.mu form in-kernel;
    # slightly looser atol guards against cancellation on tiny distances.
    np.testing.assert_allclose(np.asarray(out.nm_dist), np.asarray(ref.nm_dist),
                               rtol=1e-4, atol=5e-4)
    np.testing.assert_allclose(np.asarray(out.pred_score_all),
                               np.asarray(ref.pred_score_all),
                               rtol=1e-4, atol=1e-4)
    np.testing.assert_allclose(np.asarray(out.pred_y), np.asarray(ref.pred_y),
                               rtol=0, atol=0)
    np.testing.assert_allclose(np.asarray(out.pred_score),
                               np.asarray(ref.pred_score),
                               rtol=1e-4, atol=1e-4)

    print("KERNEL_OK")
</pallas_src>

<mosaic_0001>
module attributes {stable_mosaic.version = 11 : i64} {
  func.func @grood_fused_kernel(%arg0: i32, %arg1: memref<64x128xf32, #tpu.memory_space<vmem>>, %arg2: memref<72x64xf32, #tpu.memory_space<vmem>>, %arg3: memref<32x2xf32, #tpu.memory_space<vmem>>, %arg4: memref<4x3xf32, #tpu.memory_space<vmem>>, %arg5: memref<4x128xf32, #tpu.memory_space<vmem>>, %arg6: memref<4x128xf32, #tpu.memory_space<vmem>>, %arg7: memref<4x128xf32, #tpu.memory_space<vmem>>, %arg8: memref<1x128xf32, #tpu.memory_space<vmem>>, %arg9: memref<1x128xf32, #tpu.memory_space<vmem>>) attributes {dimension_semantics = [#tpu.dimension_semantics<parallel>], iteration_bounds = array<i64: 2>, scalar_prefetch = 0 : i64, scratch_operands = 0 : i64, tpu.core_type = #tpu.core_type<tc>, window_params = [{transform_indices = @transform_0, window_bounds = array<i64: 64, 128>}, {pipeline_mode = #tpu.pipeline_mode<synchronous>, transform_indices = @transform_1, window_bounds = array<i64: 72, 64>}, {pipeline_mode = #tpu.pipeline_mode<synchronous>, transform_indices = @transform_2, window_bounds = array<i64: 32, 2>}, {pipeline_mode = #tpu.pipeline_mode<synchronous>, transform_indices = @transform_3, window_bounds = array<i64: 4, 3>}, {transform_indices = @transform_4, window_bounds = array<i64: 4, 128>}, {transform_indices = @transform_5, window_bounds = array<i64: 4, 128>}, {transform_indices = @transform_6, window_bounds = array<i64: 4, 128>}, {transform_indices = @transform_7, window_bounds = array<i64: 1, 128>}, {transform_indices = @transform_8, window_bounds = array<i64: 1, 128>}]} {
    %c0 = arith.constant 0 : index
    %c0_0 = arith.constant 0 : index
    %0 = vector.load %arg2[%c0, %c0_0] : memref<72x64xf32, #tpu.memory_space<vmem>>, vector<72x64xf32>
    %c0_1 = arith.constant 0 : index
    %c0_2 = arith.constant 0 : index
    %1 = vector.load %arg1[%c0_1, %c0_2] : memref<64x128xf32, #tpu.memory_space<vmem>>, vector<64x128xf32>
    %cst = arith.constant dense<0.000000e+00> : vector<72x128xf32>
    %2 = tpu.matmul %0, %1, %cst {dimension_numbers = #tpu.dot_dimension_numbers<[1], [0], [0], [1], [0, 0, 1, 1], [], []>} : vector<72x64xf32>, vector<64x128xf32>, vector<72x128xf32> -> vector<72x128xf32>
    %3 = vector.extract_strided_slice %2 {offsets = [0, 0], sizes = [32, 128], strides = [1, 1]} : vector<72x128xf32> to vector<32x128xf32>
    %4 = vector.extract_strided_slice %2 {offsets = [32, 0], sizes = [4, 128], strides = [1, 1]} : vector<72x128xf32> to vector<4x128xf32>
    %5 = vector.extract_strided_slice %2 {offsets = [40, 0], sizes = [32, 128], strides = [1, 1]} : vector<72x128xf32> to vector<32x128xf32>
    %6 = arith.mulf %3, %3 : vector<32x128xf32>
    %cst_3 = arith.constant dense<0.000000e+00> : vector<128xf32>
    %7 = vector.multi_reduction <add>, %6, %cst_3 [0] : vector<32x128xf32> to vector<128xf32>
    %8 = vector.shape_cast %7 : vector<128xf32> to vector<1x128xf32>
    %c0_4 = arith.constant 0 : index
    %c0_5 = arith.constant 0 : index
    %9 = vector.load %arg3[%c0_4, %c0_5] : memref<32x2xf32, #tpu.memory_space<vmem>>, vector<32x1xf32>
    %c0_6 = arith.constant 0 : index
    %c1 = arith.constant 1 : index
    %10 = vector.load %arg3[%c0_6, %c1] : memref<32x2xf32, #tpu.memory_space<vmem>>, vector<32x1xf32>
    %11 = vector.broadcast %9 : vector<32x1xf32> to vector<32x128xf32>
    %12 = vector.broadcast %8 : vector<1x128xf32> to vector<32x128xf32>
    %13 = arith.mulf %11, %12 : vector<32x128xf32>
    %14 = vector.broadcast %10 : vector<32x1xf32> to vector<32x128xf32>
    %15 = arith.addf %13, %14 : vector<32x128xf32>
    %16 = arith.addf %15, %5 : vector<32x128xf32>
    %17 = vector.extract_strided_slice %16 {offsets = [0, 0], sizes = [16, 128], strides = [1, 1]} : vector<32x128xf32> to vector<16x128xf32>
    %18 = vector.extract_strided_slice %16 {offsets = [16, 0], sizes = [16, 128], strides = [1, 1]} : vector<32x128xf32> to vector<16x128xf32>
    %19 = arith.minimumf %17, %18 : vector<16x128xf32>
    %20 = vector.extract_strided_slice %19 {offsets = [0, 0], sizes = [8, 128], strides = [1, 1]} : vector<16x128xf32> to vector<8x128xf32>
    %21 = vector.extract_strided_slice %19 {offsets = [8, 0], sizes = [8, 128], strides = [1, 1]} : vector<16x128xf32> to vector<8x128xf32>
    %22 = arith.minimumf %20, %21 : vector<8x128xf32>
    %23 = vector.extract_strided_slice %22 {offsets = [0, 0], sizes = [4, 128], strides = [1, 1]} : vector<8x128xf32> to vector<4x128xf32>
    %24 = vector.extract_strided_slice %22 {offsets = [4, 0], sizes = [4, 128], strides = [1, 1]} : vector<8x128xf32> to vector<4x128xf32>
    %25 = arith.minimumf %23, %24 : vector<4x128xf32>
    %cst_7 = arith.constant 0.000000e+00 : f32
    %26 = vector.broadcast %cst_7 : f32 to vector<4x128xf32>
    %27 = arith.maximumf %25, %26 : vector<4x128xf32>
    %28 = math.sqrt %27 : vector<4x128xf32>
    %cst_8 = arith.constant dense<0xFF800000> : vector<128xf32>
    %29 = vector.multi_reduction <maximumf>, %4, %cst_8 [0] : vector<4x128xf32> to vector<128xf32>
    %30 = vector.shape_cast %29 : vector<128xf32> to vector<1x128xf32>
    %31 = vector.broadcast %30 : vector<1x128xf32> to vector<4x128xf32>
    %32 = arith.subf %4, %31 : vector<4x128xf32>
    %33 = math.exp %32 : vector<4x128xf32>
    %cst_9 = arith.constant dense<0.000000e+00> : vector<128xf32>
    %34 = vector.multi_reduction <add>, %33, %cst_9 [0] : vector<4x128xf32> to vector<128xf32>
    %35 = vector.shape_cast %34 : vector<128xf32> to vector<1x128xf32>
    %36 = vector.broadcast %35 : vector<1x128xf32> to vector<4x128xf32>
    %37 = arith.divf %33, %36 : vector<4x128xf32>
    %cst_10 = arith.constant 5.000000e-01 : f32
    %38 = vector.broadcast %cst_10 : f32 to vector<4x128xf32>
    %39 = arith.mulf %38, %28 : vector<4x128xf32>
    %cst_11 = arith.constant 1.000000e+00 : f32
    %40 = vector.broadcast %cst_11 : f32 to vector<4x128xf32>
    %41 = arith.addf %40, %39 : vector<4x128xf32>
    %cst_12 = arith.constant 1.000000e+00 : f32
    %42 = vector.broadcast %cst_12 : f32 to vector<4x128xf32>
    %43 = arith.divf %42, %41 : vector<4x128xf32>
    %c0_13 = arith.constant 0 : index
    %c0_14 = arith.constant 0 : index
    %44 = vector.load %arg4[%c0_13, %c0_14] : memref<4x3xf32, #tpu.memory_space<vmem>>, vector<4x1xf32>
    %45 = vector.broadcast %44 : vector<4x1xf32> to vector<4x128xf32>
    %46 = arith.mulf %45, %37 : vector<4x128xf32>
    %c0_15 = arith.constant 0 : index
    %c1_16 = arith.constant 1 : index
    %47 = vector.load %arg4[%c0_15, %c1_16] : memref<4x3xf32, #tpu.memory_space<vmem>>, vector<4x1xf32>
    %48 = vector.broadcast %47 : vector<4x1xf32> to vector<4x128xf32>
    %49 = arith.mulf %48, %43 : vector<4x128xf32>
    %50 = arith.addf %46, %49 : vector<4x128xf32>
    %c0_17 = arith.constant 0 : index
    %c2 = arith.constant 2 : index
    %51 = vector.load %arg4[%c0_17, %c2] : memref<4x3xf32, #tpu.memory_space<vmem>>, vector<4x1xf32>
    %52 = vector.broadcast %51 : vector<4x1xf32> to vector<4x128xf32>
    %53 = arith.addf %50, %52 : vector<4x128xf32>
    %cst_18 = arith.constant 0.000000e+00 : f32
    %54 = vector.broadcast %cst_18 : f32 to vector<4x128xf32>
    %55 = arith.subf %54, %53 : vector<4x128xf32>
    %56 = math.exp %55 : vector<4x128xf32>
    %cst_19 = arith.constant 1.000000e+00 : f32
    %57 = vector.broadcast %cst_19 : f32 to vector<4x128xf32>
    %58 = arith.addf %57, %56 : vector<4x128xf32>
    %cst_20 = arith.constant 1.000000e+00 : f32
    %59 = vector.broadcast %cst_20 : f32 to vector<4x128xf32>
    %60 = arith.divf %59, %58 : vector<4x128xf32>
    %61 = tpu.iota {dimensions = array<i32: 0>} : vector<4x128xi32>
    %62 = vector.broadcast %30 : vector<1x128xf32> to vector<4x128xf32>
    %63 = arith.cmpf oge, %4, %62 : vector<4x128xf32>
    %c4_i32 = arith.constant 4 : i32
    %64 = vector.broadcast %c4_i32 : i32 to vector<4x128xi32>
    %65 = arith.select %63, %61, %64 : vector<4x128xi1>, vector<4x128xi32>
    %cst_21 = arith.constant dense<2147483647> : vector<128xi32>
    %66 = vector.multi_reduction <minsi>, %65, %cst_21 [0] : vector<4x128xi32> to vector<128xi32>
    %67 = vector.shape_cast %66 : vector<128xi32> to vector<1x128xi32>
    %68 = vector.broadcast %67 : vector<1x128xi32> to vector<4x128xi32>
    %69 = arith.cmpi eq, %61, %68 : vector<4x128xi32>
    %70 = arith.extui %69 : vector<4x128xi1> to vector<4x128xi32>
    %71 = arith.sitofp %70 : vector<4x128xi32> to vector<4x128xf32>
    %72 = arith.mulf %60, %71 : vector<4x128xf32>
    %cst_22 = arith.constant dense<0.000000e+00> : vector<128xf32>
    %73 = vector.multi_reduction <add>, %72, %cst_22 [0] : vector<4x128xf32> to vector<128xf32>
    %74 = vector.shape_cast %73 : vector<128xf32> to vector<1x128xf32>
    %c0_23 = arith.constant 0 : index
    %c0_24 = arith.constant 0 : index
    %75 = vector.load %arg5[%c0_23, %c0_24] : memref<4x128xf32, #tpu.memory_space<vmem>>, vector<4x128xf32>
    tpu.vector_store %arg5[%c0_23, %c0_24], %4 {strides = array<i32>} : memref<4x128xf32, #tpu.memory_space<vmem>>, vector<4x128xf32>,
    %c0_25 = arith.constant 0 : index
    %c0_26 = arith.constant 0 : index
    %76 = vector.load %arg6[%c0_25, %c0_26] : memref<4x128xf32, #tpu.memory_space<vmem>>, vector<4x128xf32>
    tpu.vector_store %arg6[%c0_25, %c0_26], %28 {strides = array<i32>} : memref<4x128xf32, #tpu.memory_space<vmem>>, vector<4x128xf32>,
    %c0_27 = arith.constant 0 : index
    %c0_28 = arith.constant 0 : index
    %77 = vector.load %arg7[%c0_27, %c0_28] : memref<4x128xf32, #tpu.memory_space<vmem>>, vector<4x128xf32>
    tpu.vector_store %arg7[%c0_27, %c0_28], %60 {strides = array<i32>} : memref<4x128xf32, #tpu.memory_space<vmem>>, vector<4x128xf32>,
    %78 = arith.sitofp %67 : vector<1x128xi32> to vector<1x128xf32>
    %c0_29 = arith.constant 0 : index
    %c0_30 = arith.constant 0 : index
    %79 = vector.load %arg8[%c0_29, %c0_30] : memref<1x128xf32, #tpu.memory_space<vmem>>, vector<1x128xf32>
    tpu.vector_store %arg8[%c0_29, %c0_30], %78 {strides = array<i32>} : memref<1x128xf32, #tpu.memory_space<vmem>>, vector<1x128xf32>,
    %c0_31 = arith.constant 0 : index
    %c0_32 = arith.constant 0 : index
    %80 = vector.load %arg9[%c0_31, %c0_32] : memref<1x128xf32, #tpu.memory_space<vmem>>, vector<1x128xf32>
    tpu.vector_store %arg9[%c0_31, %c0_32], %74 {strides = array<i32>} : memref<1x128xf32, #tpu.memory_space<vmem>>, vector<1x128xf32>,
    return
  }
  func.func @transform_0(%arg0: i32) -> (i32, i32) {
    %c0_i32 = arith.constant 0 : i32
    %c0_i32_0 = arith.constant 0 : i32
    return %c0_i32, %arg0 : i32, i32
  }
  func.func @transform_1(%arg0: i32) -> (i32, i32) {
    %c0_i32 = arith.constant 0 : i32
    %c0_i32_0 = arith.constant 0 : i32
    %c0_i32_1 = arith.constant 0 : i32
    return %c0_i32, %c0_i32_0 : i32, i32
  }
  func.func @transform_2(%arg0: i32) -> (i32, i32) {
    %c0_i32 = arith.constant 0 : i32
    %c0_i32_0 = arith.constant 0 : i32
    %c0_i32_1 = arith.constant 0 : i32
    return %c0_i32, %c0_i32_0 : i32, i32
  }
  func.func @transform_3(%arg0: i32) -> (i32, i32) {
    %c0_i32 = arith.constant 0 : i32
    %c0_i32_0 = arith.constant 0 : i32
    %c0_i32_1 = arith.constant 0 : i32
    return %c0_i32, %c0_i32_0 : i32, i32
  }
  func.func @transform_4(%arg0: i32) -> (i32, i32) {
    %c0_i32 = arith.constant 0 : i32
    %c0_i32_0 = arith.constant 0 : i32
    return %c0_i32, %arg0 : i32, i32
  }
  func.func @transform_5(%arg0: i32) -> (i32, i32) {
    %c0_i32 = arith.constant 0 : i32
    %c0_i32_0 = arith.constant 0 : i32
    return %c0_i32, %arg0 : i32, i32
  }
  func.func @transform_6(%arg0: i32) -> (i32, i32) {
    %c0_i32 = arith.constant 0 : i32
    %c0_i32_0 = arith.constant 0 : i32
    return %c0_i32, %arg0 : i32, i32
  }
  func.func @transform_7(%arg0: i32) -> (i32, i32) {
    %c0_i32 = arith.constant 0 : i32
    %c0_i32_0 = arith.constant 0 : i32
    return %c0_i32, %arg0 : i32, i32
  }
  func.func @transform_8(%arg0: i32) -> (i32, i32) {
    %c0_i32 = arith.constant 0 : i32
    %c0_i32_0 = arith.constant 0 : i32
    return %c0_i32, %arg0 : i32, i32
  }
}

</mosaic_0001>

<bundles_post_ra>
// kernel: tpu_custom_call.1
= control target key start
LH: loop header
LB: loop body
LE: loop exit
PB: predicated region body
PF: predicated region fallthrough
CT: control target
= control target key end

     0   :  { %s1764_s0 = inlined_call_operand.vmem [shape: f32[64,256], index: 0, kind: input, shape index: {}]   ;;  %s1765_s1 = inlined_call_operand.vmem [shape: f32[72,64], index: 1, kind: input, shape index: {}]   ;;  %s1766_s2 = inlined_call_operand.vmem [shape: f32[32,2], index: 2, kind: input, shape index: {}]   ;;  %s1767_s3 = inlined_call_operand.vmem [shape: f32[4,3], index: 3, kind: input, shape index: {}]   ;;  %s1768_s4 = inlined_call_operand.hbm [shape: f32[4,256], index: 4, kind: output, shape index: {0}]   ;;  %s1769_s5 = inlined_call_operand.hbm [shape: f32[4,256], index: 5, kind: output, shape index: {1}]   ;;  %s1770_s6 = inlined_call_operand.hbm [shape: f32[4,256], index: 6, kind: output, shape index: {2}]   ;;  %s1771_s7 = inlined_call_operand.hbm [shape: f32[1,256], index: 7, kind: output, shape index: {3}]   ;;  %s1772_s8 = inlined_call_operand.hbm [shape: f32[1,256], index: 8, kind: output, shape index: {4}]  }
   0x1   :  { %1776 = sst [smem:[#allocation14_spill]] %s1764_s0 }
   0x2   :  { %1777 = sst [smem:[#allocation15_spill]] %s1765_s1 }
   0x3   :  { %14 = vsyncpa [#allocation4], 0 }
   0x4   :  { %16 = vsyncpa [#allocation4 + $0x1], 0 }
   0x5   :  { %17 = vsyncpa [#allocation6], 0 }
   0x6   :  { %19 = vsyncpa [#allocation6 + $0x1], 0 }
   0x7   :  { %20 = vsyncpa [#allocation9], 0 }
   0x8   :  { %22 = vsyncpa [#allocation9 + $0x1], 0  ;;  %s1410_s27 = smov 0   ;;  %s1412_s28 = smov 0  }
   0x9   :  { %s1414_s29 = smov 0   ;;  %s1416_s30 = smov 0  }
   0xa LB: > { %s1431_s9 = sadd.s32 4294967295, %s1352_s30   ;;  %s1773_s10 = sadd.s32 4294967294, %s1352_s30   ;;  %s1352_s30 = sphi %s1416_s30, %s1788_s30   ;;  %s1348_s29 = sphi %s1414_s29, %s1787_s29   ;;  %s1344_s28 = sphi %s1412_s28, %s1786_s28   ;;  %s1340_s27 = sphi %s1410_s27, %s1785_s27  }
   0xb   : > { %s1435_s11 = sadd.s32 1, %s1352_s30   ;;  %s35_s12 = sadd.s32 1, %s1348_s29 }
   0xc   : > { %s32_s13 = ssub.s32 %s1352_s30, %s1435_s11  ;;  %p42_p0 = scmp.ne.s32.totalorder %s1348_s29, %s1344_s28 }
   0xd   : > { %p33_p1 = scmp.eq.s32.totalorder %s32_s13, 0  ;;  %p43_p2 = scmp.eq.s32.totalorder %s1352_s30, 0 }
   0xe   : > { %p135_p3 = scmp.eq.s32.totalorder %s1431_s9, 1  ;;  %p140_p4 = scmp.ne.s32.totalorder %s1344_s28, %s1340_s27 }
   0xf   : > { %s1447_s14 = scalar_select %p33_p1, %s1348_s29, %s35_s12  }
  0x10   : > { %p44_p5 = por %p43_p2, %p42_p0  ;;  %p1449_p6 = por %p135_p3, %p42_p0 }
  0x11   : > { %p141_p7 = scmp.eq.s32.totalorder %s1773_s10, 1  ;;  %p978_p9 = scmp.ge.s32.totalorder %s1352_s30, 2 }
  0x13   : > { %p1455_p8 = por %p141_p7, %p140_p4  ;;  %270 = sbr.rel (%p978_p9) target bundleno = 40 (0x28), region = 28 }
  0x1a   : > { %273 = sbr.rel (!%p44_p5) target bundleno = 40 (0x28), region = 32  ;;  %s275_s17 = sand.u32 (%p44_p5), 1, %s1348_s29  }
  0x1b   : > { %s980_s18 = sshll.u32 (%p44_p5), %s1352_s30, 3  ;;  %s979_s19 = sshll.u32 (%p44_p5), %s275_s17, 6 }
  0x1c   : > { %s1780_s0 = sld [smem:[#allocation14_spill]] (%p44_p5)  ;;  %s277_s23 = scalar_lea.vmem (%p44_p5), [#allocation2], %s979_s19 }
  0x22   : > { %s279_s22 = scalar_lea.vmem %s1780_s0, %s980_s18 }
  0x23   : > { %v321_v0 = vld [vmem:[%s279_s22] sm:$0xff]  ;;  %v323_v1 = vld [vmem:[%s279_s22 + $0x10] sm:$0xff] }
  0x24   : > { %v325_v2 = vld [vmem:[%s279_s22 + $0x20] sm:$0xff]  ;;  %322 = vst [vmem:[%s277_s23] sm:$0xff] %v321_v0  ;;  %324 = vst [vmem:[%s277_s23 + $0x8] sm:$0xff] %v323_v1  ;;  %v327_v3 = vld [vmem:[%s279_s22 + $0x30] sm:$0xff] }
  0x25   : > { %326 = vst [vmem:[%s277_s23 + $0x10] sm:$0xff] %v325_v2  ;;  %v329_v4 = vld [vmem:[%s279_s22 + $0x40] sm:$0xff]  ;;  %v331_v5 = vld [vmem:[%s279_s22 + $0x50] sm:$0xff]  ;;  %328 = vst [vmem:[%s277_s23 + $0x18] sm:$0xff] %v327_v3 }
  0x26   : > { %330 = vst [vmem:[%s277_s23 + $0x20] sm:$0xff] %v329_v4  ;;  %332 = vst [vmem:[%s277_s23 + $0x28] sm:$0xff] %v331_v5  ;;  %v333_v6 = vld [vmem:[%s279_s22 + $0x60] sm:$0xff]  ;;  %v335_v7 = vld [vmem:[%s279_s22 + $0x70] sm:$0xff] }
  0x27   : > { %334 = vst [vmem:[%s277_s23 + $0x30] sm:$0xff] %v333_v6  ;;  %336 = vst [vmem:[%s277_s23 + $0x38] sm:$0xff] %v335_v7 }
  0x28 PF: > { %p981_p10 = scmp.ge.s32.totalorder %s1352_s30, 1  ;;  %p341_p11 = scmp.lt.s32.totalorder %s1352_s30, 3 }
  0x2a   : > { %p342_p12 = pnand %p981_p10, %p341_p11 }
  0x2b   : > { %s1470_s24 = sand.u32 (!%p342_p12), 1, %s1344_s28   ;;  %v1354_v8 = vmov (!%p342_p12), 0.0|0.0   ;;  %vm1355_vm0 = vmmov (!%p342_p12), 0   ;;  %v1356_v9 = vmov (!%p342_p12), 0.0   ;;  %v1357_v13 = vmov (!%p342_p12), 0   ;;  %v567_v17 = vld [vmem:[%s1766_s2] sm:$0xff] (!%p342_p12) }
  0x2c   : > { %345 = sbr.rel (%p342_p12) target bundleno = 460 (0x1cc), region = 70  ;;  %1066 = vmatprep.subr.bf16.mxu0 (!%p342_p12), %v1354_v8  ;;  %s982_s25 = sshll.u32 (!%p342_p12), %s1470_s24, 6  ;;  %1039 = vmatprep.mubr.msk.f32.mxu0 (!%p342_p12), %vm1355_vm0, %v1356_v9  ;;  %v569_v18 = vld [vmem:[%s1766_s2 + $0x10] sm:$0xff] (!%p342_p12)  ;;  %v568_v21 = vld [vmem:[%s1766_s2 + $0x8] sm:$0xff] (!%p342_p12)  ;;  %v570_v22 = vld [vmem:[%s1766_s2 + $0x18] sm:$0xff] (!%p342_p12)  ;;  %v1358_v27 = vmov (!%p342_p12), 1  }
  0x2d   : > { %1078 = vmatprep.subr.bf16.mxu1 (!%p342_p12), %v1354_v8  ;;  %1054 = vmatprep.mubr.msk.f32.mxu1 (!%p342_p12), %vm1355_vm0, %v1356_v9  ;;  %s350_s26 = scalar_lea.vmem (!%p342_p12), [#allocation2], %s982_s25  ;;  %s1781_s1 = sld [smem:[#allocation15_spill]] (!%p342_p12)  ;;  %vm416_vm1 = vcmask (!%p342_p12), 523264   ;;  %v658_v32 = vld [vmem:[%s1767_s3] sm:$0xf] (!%p342_p12)  ;;  %v1359_v37 = vmov (!%p342_p12), 2  }
  0x2e   : > { %v408_v10 = vld [vmem:[%s350_s26] sm:$0xff] (!%p342_p12)  ;;  %v409_v11 = vld [vmem:[%s350_s26 + $0x8] sm:$0xff] (!%p342_p12)  ;;  %v410_v12 = vld [vmem:[%s350_s26 + $0x10] sm:$0xff] (!%p342_p12)  ;;  %1151 = vset.pattern.permute.xlu0 (!%p342_p12), %v1357_v13  ;;  %1152 = vset.pattern.permute.xlu1 (!%p342_p12), %v1357_v13  ;;  %s1549_s21 = sshll.u32 (!%p342_p12), %s1470_s24, 2  ;;  %s1556_s22 = sshll.u32 (!%p342_p12), %s1431_s9, 6  ;;  %vm634_vm2 = vcmask (!%p342_p12), 1043456  }
  0x2f   : > { %v1067_v14 = vpack.c.bf16 (!%p342_p12), %v409_v11, %v408_v10  ;;  %v411_v15 = vld [vmem:[%s350_s26 + $0x18] sm:$0xff] (!%p342_p12)  ;;  %v412_v19 = vld [vmem:[%s350_s26 + $0x20] sm:$0xff] (!%p342_p12)  ;;  %v413_v20 = vld [vmem:[%s350_s26 + $0x28] sm:$0xff] (!%p342_p12)  ;;  %573 = vperm.xlu0 (!%p342_p12), %1151, %v567_v17   ;;  %583 = vperm.xlu1 (!%p342_p12), %1152, %v569_v18   ;;  %s372_s23 = scalar_lea.vmem (!%p342_p12), [#allocation3], %s1549_s21  ;;  %s1563_s13 = scalar_lea.hbm (!%p342_p12), %s1768_s4, %s1556_s22 }
  0x30   : > { %v1070_v16 = vpack.c.bf16 (!%p342_p12), %v411_v15, %v410_v12  ;;  %v1073_v23 = vpack.c.bf16 (!%p342_p12), %v413_v20, %v412_v19  ;;  %v414_v24 = vld [vmem:[%s350_s26 + $0x30] sm:$0xff] (!%p342_p12)  ;;  %v415_v25 = vld [vmem:[%s350_s26 + $0x38] sm:$0xff] (!%p342_p12)  ;;  %s745_s25 = sshll.u32 (!%p342_p12), %s372_s23, 4  ;;  %s714_s17 = scalar_lea.sflag (!%p342_p12), [#allocation4], %s1470_s24  ;;  %s1565_s25 = int_to_ptr.vmem [resolvable:$true] %s745_s25 }
  0x31   : > { %1068 = vmatpush3.bf16.msra.mxu0 (!%p342_p12), %v1067_v14  ;;  %1082 = vmatpush3.bf16.msra.mxu1 (!%p342_p12), %v1067_v14  ;;  %v1076_v26 = vpack.c.bf16 (!%p342_p12), %v415_v25, %v414_v24  ;;  %s1170_s18 = scalar_lea.vmem (!%p342_p12), %s1565_s25, 64  ;;  %s1360_s19 = smov (!%p342_p12), [#allocation3]  }
  0x32   : > { %1069 = vmatprep.subr.bf16.mxu0 (!%p342_p12), %v1354_v8  ;;  %1079 = vmatprep.subr.bf16.mxu1 (!%p342_p12), %v1354_v8  ;;  %p1171_p13 = scmp.ne.s32.totalorder (!%p342_p12), %s1565_s25, %s1170_s18  ;;  %s1174_s20 = sshll.u32 (!%p342_p12), %s1360_s19, 4  ;;  %s1175_s20 = int_to_ptr.vmem [resolvable:$false] %s1174_s20 }
  0x33   : > { %578 = vperm.xlu0 %1151, %v568_v21   ;;  %588 = vperm.xlu1 %1152, %v570_v22   ;;  %v399_v28 = vld [vmem:[%s1781_s1] sm:$0xff]  ;;  %v404_v29 = vld [vmem:[%s1781_s1 + $0x28] sm:$0xff]  ;;  %v405_v31 = vld [vmem:[%s1781_s1 + $0x30] sm:$0xff]  ;;  %s1176_s26 = scalar_lea.vmem %s1175_s20, 128  ;;  %p1177_p2 = scmp.lt.s32.totalorder %s1565_s25, %s1175_s20 }
  0x34   : > { %v400_v30 = vld [vmem:[%s1781_s1 + $0x8] sm:$0xff]  ;;  %v401_v33 = vld [vmem:[%s1781_s1 + $0x10] sm:$0xff]  ;;  %v406_v34 = vld [vmem:[%s1781_s1 + $0x38] sm:$0xff]  ;;  %p1172_p0 = pnand %p1171_p13, %p1449_p6  ;;  %p1178_p3 = scmp.lt.s32.totalorder %s1176_s26, %s1170_s18 }
  0x35   : > { %1071 = vmatpush3.bf16.msra.mxu0 %v1070_v16  ;;  %1083 = vmatpush3.bf16.msra.mxu1 %v1070_v16  ;;  %v402_v35 = vld [vmem:[%s1781_s1 + $0x18] sm:$0xff]  ;;  %v407_v36 = vld [vmem:[%s1781_s1 + $0x40] sm:$0xff] }
  0x36   : > { %1072 = vmatprep.subr.bf16.mxu0 %v1354_v8  ;;  %1080 = vmatprep.subr.bf16.mxu1 %v1354_v8  ;;  %v403_v38 = vld [vmem:[%s1781_s1 + $0x20] sm:$0xff]  ;;  %p1173_p1 = pneg %p1172_p0  ;;  %p1179_p4 = por %p1178_p3, %p1177_p2 }
  0x37   : > { %1153 = vset.pattern.permute.xlu0 %v1358_v27  ;;  %1154 = vset.pattern.permute.xlu1 %v1358_v27 }
  0x38   : > { %596 = vperm.xlu0 %1153, %v567_v17   ;;  %600 = vperm.xlu1 %1154, %v568_v21   ;;  %p1180_p5 = pnand %p1179_p4, %p1173_p1 }
  0x39   : > { %1074 = vmatpush3.bf16.msra.mxu0 %v1073_v23  ;;  %1084 = vmatpush3.bf16.msra.mxu1 %v1073_v23 }
  0x3a   : > { %1075 = vmatprep.subr.bf16.mxu0 %v1354_v8  ;;  %1081 = vmatprep.subr.bf16.mxu1 %v1354_v8 }
  0x3c   : > { %608 = vperm.xlu0 %1153, %v570_v22   ;;  %604 = vperm.xlu1 %1154, %v569_v18  }
  0x3d   : > { %1077 = vmatpush3.bf16.msra.mxu0 %v1076_v26  ;;  %1085 = vmatpush3.bf16.msra.mxu1 %v1076_v26 }
  0x40   : > { %1040 = vmatmul.mubr.msk.f32.vlgmr.msra.gmra.mrb[0].mxu0 %vm416_vm1, %v399_v28  ;;  %1055 = vmatmul.mubr.msk.f32.vlgmr.msra.gmra.mrb[0].mxu1 %vm416_vm1, %v404_v29 }
  0x41   : > { %1042 = vmatprep.mubr.msk.f32.mxu0 %vm1355_vm0, %v1356_v9  ;;  %1057 = vmatprep.mubr.msk.f32.mxu1 %vm1355_vm0, %v1356_v9 }
  0x42   : > { %666 = vperm.xlu0 %1153, %v658_v32   ;;  %1155 = vset.pattern.permute.xlu1 %v1357_v13 }
  0x43   : > { %661 = vperm.xlu1 %1155, %v658_v32  }
  0x44   : > { %1043 = vmatmul.mubr.msk.f32.gmra.mrb[2].mxu0 %vm416_vm1, %v400_v30  ;;  %1058 = vmatmul.mubr.msk.f32.gmra.mrb[2].mxu1 %vm416_vm1, %v405_v31 }
  0x45   : > { %1045 = vmatprep.mubr.msk.f32.mxu0 %vm1355_vm0, %v1356_v9  ;;  %1060 = vmatprep.mubr.msk.f32.mxu1 %vm1355_vm0, %v1356_v9 }
  0x46   : > { %1157 = vset.pattern.permute.xlu0 %v1359_v37 }
  0x47   : > { %1156 = vset.pattern.permute.xlu1 %v1359_v37 }
  0x48   : > { %1046 = vmatmul.mubr.msk.f32.gmra.mrb[4].mxu0 %vm416_vm1, %v401_v33  ;;  %1061 = vmatmul.mubr.msk.f32.gmra.mrb[4].mxu1 %vm416_vm1, %v406_v34 }
  0x49   : > { %1048 = vmatprep.mubr.msk.f32.mxu0 %vm1355_vm0, %v1356_v9  ;;  %1063 = vmatprep.mubr.msk.f32.mxu1 %vm1355_vm0, %v1356_v9 }
  0x4a   : > { %672 = vperm.xlu1 %1156, %v658_v32  }
  0x4c   : > { %1049 = vmatmul.mubr.msk.f32.gmra.mrb[6].mxu0 %vm416_vm1, %v402_v35  ;;  %1064 = vmatmul.mubr.msk.f32.gmra.mrb[6].mxu1 %vm416_vm1, %v407_v36 }
  0x4d   : > { %1051 = vmatprep.mubr.msk.f32.mxu0 %vm1355_vm0, %v1356_v9 }
  0x50   : > { %1052 = vmatmul.mubr.msk.f32.gmra.mrb[8].mxu0 %vm416_vm1, %v403_v38 }
  0xae   : > { %v1551_v56 = vpop.permute.xlu0 %573  ;;  %v584_v57 = vpop.permute.xlu1 %583 }
  0xb2   : > { %v579_v4 = vpop.permute.xlu0 %578 }
 0x113   : > { %v510_v39 = vpop.f32.mrb[0].mxu0  ;;  %v1542_v40 = vpop.f32.mrb[0].mxu1 }
 0x114   : > { %v1041_v41 = vpop.f32.mrb[1].mxu0  ;;  %v1056_v42 = vpop.f32.mrb[1].mxu1  ;;  %v554_v45 = vmul.f32 %v510_v39, %v510_v39 }
 0x117   : > { %v515_v43 = vpop.f32.mrb[2].mxu0  ;;  %v1544_v44 = vpop.f32.mrb[2].mxu1 }
 0x118   : > { %v555_v46 = vmul.f32 %v515_v43, %v515_v43  ;;  %v1044_v47 = vpop.f32.mrb[3].mxu0  ;;  %v1059_v48 = vpop.f32.mrb[3].mxu1 }
 0x11a   : > { %v558_v49 = vadd.f32 %v555_v46, %v554_v45 }
 0x11b   : > { %v520_v50 = vpop.f32.mrb[4].mxu0  ;;  %v1546_v51 = vpop.f32.mrb[4].mxu1 }
 0x11c   : > { %v556_v52 = vmul.f32 %v520_v50, %v520_v50  ;;  %v1047_v53 = vpop.f32.mrb[5].mxu0  ;;  %v1062_v54 = vpop.f32.mrb[5].mxu1 }
 0x11e   : > { %v559_v55 = vadd.f32 %v558_v49, %v556_v52 }
 0x11f   : > { %v525_v58 = vpop.f32.mrb[6].mxu0  ;;  %v1553_v59 = vpop.f32.mrb[6].mxu1 }
 0x120   : > { %v557_v60 = vmul.f32 %v525_v58, %v525_v58  ;;  %v1050_v61 = vpop.f32.mrb[7].mxu0  ;;  %v1065_v62 = vpop.f32.mrb[7].mxu1 }
 0x122   : > { %v560_v63 = vadd.f32 %v559_v55, %v557_v60 }
 0x123   : > { %v530_v0 = vpop.f32.mrb[8].mxu0 }
 0x124   : > { %v561_v1 = vrot.slane %v560_v63, 4  ;;  %v635_v2 = vsel %vm634_vm2, %v530_v0, -inf  ;;  %v1053_v3 = vpop.f32.mrb[9].mxu0  ;;  %707 = vst [vmem:[%s372_s23] sm:$0xf] %v530_v0 }
 0x125   : > { %v636_v5 = vrot.slane %v635_v2, 4 }
 0x126   : > { %1183 = shalt.err (!%p1180_p5)
}
 0x127   : > { %s1184_s23 = scalar_lea.hbm %s1563_s13, 64  ;;  %s1188_s19 = scalar_lea.hbm %s1768_s4, 128 }
 0x128   : > { %p1185_p7 = scmp.ne.s32.totalorder %s1563_s13, %s1184_s23  ;;  %p1189_p12 = scmp.lt.u32.totalorder %s1563_s13, %s1768_s4 }
 0x129   : > { %p1190_p13 = scmp.lt.u32.totalorder %s1188_s19, %s1184_s23  ;;  %p1192_p1 = scmp.lt.u32.totalorder %s1184_s23, %s1563_s13 }
 0x12a   : > { %p1186_p10 = pnand %p1185_p7, %p1449_p6 }
 0x12b   : > { %p1191_p0 = por %p1190_p13, %p1189_p12 }
 0x12c   : > { %p1187_p11 = pneg %p1186_p10 }
 0x12d   : > { %p1193_p2 = por %p1192_p1, %p1191_p0 }
 0x12f   : > { %p1194_p3 = pnand %p1193_p2, %p1187_p11 }
 0x131   : > { %1197 = shalt.err (!%p1194_p3)
}
 0x132   : > { %1086 = dma.vmem_to_hbm [thread:$0]  (%p1449_p6), %s1565_s25, 64, %s1563_s13, %s714_s17   ;;  %v562_v6 = vadd.f32 %v561_v1, %v560_v63  ;;  %v589_v7 = vpop.permute.xlu1 %588  ;;  %v637_v8 = vmax.f32 %v635_v2, %v636_v5  ;;  %v682_v13 = vlaneseq  ;;  %v597_v15 = vpop.permute.xlu0 %596 }
 0x133   : > { %s1775_s0 = sand.u32 1, %s1431_s9   ;;  %s1774_s10 = sshll.u32 %s1431_s9, 4 }
 0x134   : > { %v563_v10 = vrot.slane %v562_v6, 2  ;;  %v638_v11 = vrot.slane %v637_v8, 2  ;;  %v1590_v20 = vshrl.u32 %v682_v13, 7  ;;  %s392_s25 = scalar_lea.vmem [#allocation8], %s1470_s24  ;;  %s1616_s26 = scalar_lea.hbm %s1771_s7, %s1774_s10 }
 0x135   : > { %s784_s13 = sshll.u32 %s392_s25, 4  ;;  %s1622_s23 = scalar_lea.sflag [#allocation9], %s1775_s0  ;;  %s1618_s13 = int_to_ptr.vmem [resolvable:$true] %s784_s13 }
 0x136   : > { %v564_v12 = vadd.f32 %v563_v10, %v562_v6  ;;  %v639_v14 = vmax.f32 %v637_v8, %v638_v11  ;;  %v601_v17 = vpop.permute.xlu1 %600  ;;  %v609_v27 = vpop.permute.xlu0 %608  ;;  %s1198_s12 = scalar_lea.vmem %s1618_s13, 16  ;;  %s1361_s19 = smov [#allocation8]  }
 0x137   : > { %p1199_p4 = scmp.ne.s32.totalorder %s1618_s13, %s1198_s12  ;;  %s1202_s20 = sshll.u32 %s1361_s19, 4  ;;  %s1203_s20 = int_to_ptr.vmem [resolvable:$false] %s1202_s20 }
 0x138   : > { %v565_v16 = vrot.slane %v564_v12, 1  ;;  %v640_v18 = vrot.slane %v639_v14, 1  ;;  %s1204_s17 = scalar_lea.vmem %s1203_s20, 32  ;;  %p1205_p10 = scmp.lt.s32.totalorder %s1618_s13, %s1203_s20 }
 0x139   : > { %p1200_p5 = pnand %p1199_p4, %p1449_p6  ;;  %p1206_p11 = scmp.lt.s32.totalorder %s1204_s17, %s1198_s12 }
 0x13a   : > { %v566_v19 = vadd.f32 %v565_v16, %v564_v12  ;;  %v641_v21 = vmax.f32 %v639_v14, %v640_v18  ;;  %v605_v32 = vpop.permute.xlu1 %604 }
 0x13b   : > { %p1201_p7 = pneg %p1200_p5  ;;  %p1207_p12 = por %p1206_p11, %p1205_p10 }
 0x13c   : > { %v593_v22 = vmul.f32 %v584_v57, %v566_v19  ;;  %v592_v23 = vmul.f32 %v579_v4, %v566_v19  ;;  %v594_v24 = vmul.f32 %v589_v7, %v566_v19  ;;  %v591_v25 = vmul.f32 %v1551_v56, %v566_v19 }
 0x13d   : > { %v642_v26 = vsub.f32 %v530_v0, %v641_v21  ;;  %vm684_vm3 = vcmp.ge.f32.partialorder %v530_v0, %v641_v21  ;;  %p1208_p13 = pnand %p1207_p12, %p1201_p7 }
 0x13e   : > { %v685_v28 = vsel %vm684_vm3, %v1590_v20, 4  ;;  %v611_v29 = vadd.f32 %v597_v15, %v591_v25  ;;  %v612_v30 = vadd.f32 %v601_v17, %v592_v23  ;;  %v614_v31 = vadd.f32 %v609_v27, %v594_v24 }
 0x13f   : > { %v643_v33 = vmul.f32 1.442695, %v642_v26  ;;  %v686_v34 = vsel %vm634_vm2, %v685_v28, 2147483647  ;;  %v613_v35 = vadd.f32 %v605_v32, %v593_v22 }
 0x140   : > { %v687_v36 = vrot.slane %v686_v34, 4  ;;  %v615_v37 = vadd.f32 %v611_v29, %v1542_v40  ;;  %v616_v38 = vadd.f32 %v612_v30, %v1544_v44  ;;  %v618_v39 = vadd.f32 %v614_v31, %v1553_v59 }
 0x141   : > { %1158 = vpow2.f32 %v643_v33  ;;  %v617_v41 = vadd.f32 %v613_v35, %v1546_v51 }
 0x142   : > { %vm688_vm4 = vcmp.lt.s32.totalorder %v686_v34, %v687_v36  ;;  %v620_v42 = vmin.f32 %v616_v38, %v618_v39 }
 0x143   : > { %v689_v43 = vsel %vm688_vm4, %v686_v34, %v687_v36  ;;  %v619_v45 = vmin.f32 %v615_v37, %v617_v41 }
 0x144   : > { %v690_v46 = vrot.slane %v689_v43, 2 }
 0x145   : > { %v621_v47 = vmin.f32 %v619_v45, %v620_v42 }
 0x146   : > { %vm691_vm5 = vcmp.lt.s32.totalorder %v689_v43, %v690_v46 }
 0x147   : > { %v623_v48 = vrot.slane %v621_v47, 4  ;;  %v692_v49 = vsel %vm691_vm5, %v689_v43, %v690_v46 }
 0x148   : > { %v693_v40 = vrot.slane %v692_v49, 1 }
 0x149   : > { %v625_v44 = vmin.f32 %v621_v47, %v623_v48 }
 0x14a   : > { %vm694_vm6 = vcmp.lt.s32.totalorder %v692_v49, %v693_v40 }
 0x14b   : > { %v1602_v50 = vpop.eup %1158  ;;  %v626_v51 = vmax.f32 %v625_v44, 0.0  ;;  %v1604_v52 = vsel %vm694_vm6, %v692_v49, %v693_v40 }
 0x14c   : > { %v645_v53 = vsel %vm634_vm2, %v1602_v50, 0.0  ;;  %vm696_vm7 = vcmp.eq.s32.totalorder %v1590_v20, %v1604_v52  ;;  %v710_v54 = vcvt.s32.f32 %v1604_v52 }
 0x14d   : > { %v646_v55 = vrot.slane %v645_v53, 4  ;;  %1160 = vrsqrt.f32 %v626_v51 }
 0x14e   : > { %711 = vst [vmem:[%s392_s25] sm:$0x1] %v710_v54 }
 0x14f   : > { %v647_v56 = vadd.f32 %v646_v55, %v645_v53 }
 0x150   : > { %1211 = shalt.err (!%p1208_p13)
}
 0x151   : > { %s1212_s25 = scalar_lea.hbm %s1616_s26, 16  ;;  %s1216_s19 = scalar_lea.hbm %s1771_s7, 32 }
 0x152   : > { %p1213_p0 = scmp.ne.s32.totalorder %s1616_s26, %s1212_s25  ;;  %p1217_p3 = scmp.lt.u32.totalorder %s1616_s26, %s1771_s7 }
 0x153   : > { %p1218_p4 = scmp.lt.u32.totalorder %s1216_s19, %s1212_s25  ;;  %p1220_p7 = scmp.lt.u32.totalorder %s1212_s25, %s1616_s26 }
 0x154   : > { %p1214_p1 = pnand %p1213_p0, %p1449_p6 }
 0x155   : > { %p1219_p5 = por %p1218_p4, %p1217_p3 }
 0x156   : > { %p1215_p2 = pneg %p1214_p1 }
 0x157   : > { %p1221_p10 = por %p1220_p7, %p1219_p5 }
 0x159   : > { %p1222_p11 = pnand %p1221_p10, %p1215_p2 }
 0x15b   : > { %1225 = shalt.err (!%p1222_p11)
}
 0x15c   : > { %1089 = dma.vmem_to_hbm [thread:$0]  (%p1449_p6), %s1618_s13, 16, %s1616_s26, %s1622_s23   ;;  %v648_v57 = vrot.slane %v647_v56, 2  ;;  %v1161_v60 = vpop.eup %1160  ;;  %vm629_vm8 = vcmp.eq.f32.partialorder %v626_v51, inf  ;;  %v632_v63 = vand.u32 2147483648, %v626_v51  ;;  %vm631_vm9 = vcmp.eq.f32.partialorder %v626_v51, 0.0 }
 0x15d   : > { %s379_s0 = scalar_lea.vmem [#allocation5], %s1549_s21  ;;  %v628_v62 = vmul.f32 %v1161_v60, %v626_v51  ;;  %s1651_s25 = scalar_lea.hbm %s1769_s5, %s1556_s22 }
 0x15e   : > { %v649_v58 = vadd.f32 %v648_v57, %v647_v56  ;;  %s758_s10 = sshll.u32 %s379_s0, 4  ;;  %s1782_s13 = sand.u32 1, %s1431_s9   ;;  %s1653_s10 = int_to_ptr.vmem [resolvable:$true] %s758_s10 }
 0x15f   : > { %v630_v0 = vsel %vm629_vm8, %v626_v51, %v628_v62  ;;  %s1657_s26 = scalar_lea.sflag [#allocation6], %s1782_s13  ;;  %s1226_s18 = scalar_lea.vmem %s1653_s10, 64 }
 0x160   : > { %v650_v59 = vrot.slane %v649_v58, 1  ;;  %v633_v1 = vsel %vm631_vm9, %v632_v63, %v630_v0  ;;  %p1227_p12 = scmp.ne.s32.totalorder %s1653_s10, %s1226_s18  ;;  %s1362_s19 = smov [#allocation5]  }
 0x161   : > { %v654_v2 = vmul.f32 0.5, %v633_v1  ;;  %708 = vst [vmem:[%s379_s0] sm:$0xf] %v633_v1  ;;  %s1230_s20 = sshll.u32 %s1362_s19, 4  ;;  %s1231_s20 = int_to_ptr.vmem [resolvable:$false] %s1230_s20 }
 0x162   : > { %v651_v61 = vadd.f32 %v650_v59, %v649_v58  ;;  %p1228_p13 = pnand %p1227_p12, %p1449_p6  ;;  %s1232_s12 = scalar_lea.vmem %s1231_s20, 128 }
 0x163   : > { %p1233_p1 = scmp.lt.s32.totalorder %s1653_s10, %s1231_s20  ;;  %p1234_p2 = scmp.lt.s32.totalorder %s1232_s12, %s1226_s18 }
 0x164   : > { %1162 = vrcp.f32 %v651_v61  ;;  %p1229_p0 = pneg %p1228_p13 }
 0x165   : > { %p1235_p3 = por %p1234_p2, %p1233_p1 }
 0x167   : > { %p1236_p4 = pnand %p1235_p3, %p1229_p0 }
 0x169   : > { %1239 = shalt.err (!%p1236_p4)
}
 0x16a   : > { %s1240_s0 = scalar_lea.hbm %s1651_s25, 64  ;;  %s1244_s19 = scalar_lea.hbm %s1769_s5, 128 }
 0x16b   : > { %p1241_p5 = scmp.ne.s32.totalorder %s1651_s25, %s1240_s0  ;;  %p1245_p11 = scmp.lt.u32.totalorder %s1651_s25, %s1769_s5 }
 0x16c   : > { %p1246_p12 = scmp.lt.u32.totalorder %s1244_s19, %s1240_s0  ;;  %p1248_p0 = scmp.lt.u32.totalorder %s1240_s0, %s1651_s25 }
 0x16d   : > { %p1242_p7 = pnand %p1241_p5, %p1449_p6 }
 0x16e   : > { %p1247_p13 = por %p1246_p12, %p1245_p11 }
 0x16f   : > { %p1243_p10 = pneg %p1242_p7 }
 0x170   : > { %p1249_p1 = por %p1248_p0, %p1247_p13 }
 0x172   : > { %p1250_p2 = pnand %p1249_p1, %p1243_p10 }
 0x174   : > { %1253 = shalt.err (!%p1250_p2)
}
 0x175   : > { %1087 = dma.vmem_to_hbm [thread:$0]  (%p1449_p6), %s1653_s10, 64, %s1651_s25, %s1657_s26   ;;  %v655_v3 = vadd.f32 1.0, %v654_v2  ;;  %v1163_v4 = vpop.eup %1162  ;;  %v662_v6 = vpop.permute.xlu1 %661  ;;  %v995_v21 = vsel %vm696_vm7, 1.0, %v1356_v9 }
 0x176   : > { %v653_v5 = vmul.f32 %v1163_v4, %v1602_v50  ;;  %v667_v8 = vpop.permute.xlu0 %666  ;;  %s386_s1 = scalar_lea.vmem [#allocation7], %s1549_s21  ;;  %s1687_s12 = scalar_lea.hbm %s1770_s6, %s1556_s22 }
 0x177   : > { %1164 = vrcp.f32 %v655_v3  ;;  %s771_s10 = sshll.u32 %s386_s1, 4  ;;  %s1363_s22 = smov [#allocation7]   ;;  %s1689_s10 = int_to_ptr.vmem [resolvable:$true] %s771_s10 }
 0x178   : > { %v664_v10 = vmul.f32 %v662_v6, %v653_v5  ;;  %s1254_s21 = scalar_lea.vmem %s1689_s10, 64  ;;  %s1258_s0 = sshll.u32 %s1363_s22, 4  ;;  %s1259_s0 = int_to_ptr.vmem [resolvable:$false] %s1258_s0 }
 0x179   : > { %v673_v12 = vpop.permute.xlu1 %672  ;;  %p1255_p3 = scmp.ne.s32.totalorder %s1689_s10, %s1254_s21  ;;  %s1260_s17 = scalar_lea.vmem %s1259_s0, 128 }
 0x17a   : > { %p1261_p7 = scmp.lt.s32.totalorder %s1689_s10, %s1259_s0  ;;  %p1262_p10 = scmp.lt.s32.totalorder %s1260_s17, %s1254_s21 }
 0x17b   : > { %p1256_p4 = pnand %p1255_p3, %p1449_p6 }
 0x17c   : > { %p1263_p11 = por %p1262_p10, %p1261_p7 }
 0x17d   : > { %p1257_p5 = pneg %p1256_p4 }
 0x17f   : > { %p1264_p12 = pnand %p1263_p11, %p1257_p5 }
 0x181   : > { %v1165_v7 = vpop.eup %1164 }
 0x182   : > { %v669_v11 = vmul.f32 %v1165_v7, %v667_v8 }
 0x184   : > { %v670_v13 = vadd.f32 %v669_v11, %v664_v10 }
 0x186   : > { %v675_v14 = vadd.f32 %v673_v12, %v670_v13 }
 0x188   : > { %v676_v15 = vsub.f32 0.0, %v675_v14 }
 0x18a   : > { %v677_v16 = vmul.f32 1.442695, %v676_v15 }
 0x18c   : > { %1166 = vpow2.f32 %v677_v16 }
 0x196   : > { %v1167_v17 = vpop.eup %1166 }
 0x197   : > { %v679_v18 = vadd.f32 1.0, %v1167_v17 }
 0x199   : > { %1168 = vrcp.f32 %v679_v18 }
 0x1a3   : > { %v1169_v19 = vpop.eup %1168 }
 0x1a4   : > { %v699_v22 = vmul.f32 %v1169_v19, %v995_v21  ;;  %709 = vst [vmem:[%s386_s1] sm:$0xf] %v1169_v19 }
 0x1a5   : > { %1267 = shalt.err (!%p1264_p12)
}
 0x1a6   : > { %s1268_s13 = scalar_lea.hbm %s1687_s12, 64  ;;  %s1272_s1 = scalar_lea.hbm %s1770_s6, 128 }
 0x1a7   : > { %p1269_p13 = scmp.ne.s32.totalorder %s1687_s12, %s1268_s13  ;;  %p1273_p2 = scmp.lt.u32.totalorder %s1687_s12, %s1770_s6 }
 0x1a8   : > { %p1274_p3 = scmp.lt.u32.totalorder %s1272_s1, %s1268_s13  ;;  %p1276_p5 = scmp.lt.u32.totalorder %s1268_s13, %s1687_s12 }
 0x1a9   : > { %p1270_p0 = pnand %p1269_p13, %p1449_p6 }
 0x1aa   : > { %p1275_p4 = por %p1274_p3, %p1273_p2 }
 0x1ab   : > { %p1271_p1 = pneg %p1270_p0 }
 0x1ac   : > { %p1277_p7 = por %p1276_p5, %p1275_p4 }
 0x1ae   : > { %p1278_p10 = pnand %p1277_p7, %p1271_p1 }
 0x1b0   : > { %1281 = shalt.err (!%p1278_p10)
}
 0x1b1   : > { %1088 = dma.vmem_to_hbm [thread:$0]  (%p1449_p6), %s1689_s10, 64, %s1687_s12, %s1657_s26   ;;  %v700_v9 = vsel %vm634_vm2, %v699_v22, 0.0 }
 0x1b2   : > { %v701_v20 = vrot.slane %v700_v9, 4  ;;  %s398_s21 = scalar_lea.vmem [#allocation10], %s1470_s24  ;;  %s1783_s0 = sshll.u32 %s1431_s9, 4 }
 0x1b3   : > { %s797_s22 = sshll.u32 %s398_s21, 4  ;;  %s1724_s19 = scalar_lea.hbm %s1772_s8, %s1783_s0  ;;  %s798_s22 = int_to_ptr.vmem [resolvable:$true] %s797_s22 }
 0x1b4   : > { %v702_v23 = vadd.f32 %v701_v20, %v700_v9  ;;  %s1282_s20 = scalar_lea.vmem %s798_s22, 16  ;;  %s1364_s26 = smov [#allocation10]  }
 0x1b5   : > { %p1283_p11 = scmp.ne.s32.totalorder %s798_s22, %s1282_s20  ;;  %s1286_s10 = sshll.u32 %s1364_s26, 4  ;;  %s1287_s10 = int_to_ptr.vmem [resolvable:$false] %s1286_s10 }
 0x1b6   : > { %v703_v24 = vrot.slane %v702_v23, 2  ;;  %s1288_s24 = scalar_lea.vmem %s1287_s10, 32  ;;  %p1289_p0 = scmp.lt.s32.totalorder %s798_s22, %s1287_s10 }
 0x1b7   : > { %p1284_p12 = pnand %p1283_p11, %p1449_p6  ;;  %p1290_p1 = scmp.lt.s32.totalorder %s1288_s24, %s1282_s20 }
 0x1b8   : > { %v704_v25 = vadd.f32 %v703_v24, %v702_v23 }
 0x1b9   : > { %p1285_p13 = pneg %p1284_p12  ;;  %p1291_p2 = por %p1290_p1, %p1289_p0 }
 0x1ba   : > { %v705_v26 = vrot.slane %v704_v25, 1 }
 0x1bb   : > { %p1292_p3 = pnand %p1291_p2, %p1285_p13 }
 0x1bc   : > { %v706_v27 = vadd.f32 %v705_v26, %v704_v25 }
 0x1be   : > { %712 = vst [vmem:[%s398_s21] sm:$0x1] %v706_v27 }
 0x1bf   : > { %1295 = shalt.err (!%p1292_p3)
}
 0x1c0   : > { %s1296_s9 = scalar_lea.hbm %s1724_s19, 16  ;;  %s1300_s25 = scalar_lea.hbm %s1772_s8, 32 }
 0x1c1   : > { %p1297_p4 = scmp.ne.s32.totalorder %s1724_s19, %s1296_s9  ;;  %p1301_p10 = scmp.lt.u32.totalorder %s1724_s19, %s1772_s8 }
 0x1c2   : > { %p1302_p11 = scmp.lt.u32.totalorder %s1300_s25, %s1296_s9  ;;  %p1304_p13 = scmp.lt.u32.totalorder %s1296_s9, %s1724_s19 }
 0x1c3   : > { %p1298_p5 = pnand %p1297_p4, %p1449_p6 }
 0x1c4   : > { %p1303_p12 = por %p1302_p11, %p1301_p10 }
 0x1c5   : > { %p1299_p7 = pneg %p1298_p5 }
 0x1c6   : > { %p1305_p0 = por %p1304_p13, %p1303_p12 }
 0x1c8   : > { %p1306_p1 = pnand %p1305_p0, %p1299_p7 }
 0x1ca   : > { %1309 = shalt.err (!%p1306_p1)
}
 0x1cb   : > { %1090 = dma.vmem_to_hbm [thread:$0]  (%p1449_p6), %s798_s22, 16, %s1724_s19, %s1622_s23  }
 0x1cc PF: > { %s809_s0 = sand.u32 1, %s1340_s27   ;;  %p1097_p2 = pnand %p978_p9, %p1455_p8 }
 0x1cd   : > { %s810_s17 = scalar_lea.sflag [#allocation4], %s809_s0 }
 0x1ce   : > { %1327 = dma.done.wait (!%p1097_p2), %s810_s17, 64  }
 0x1cf   : > { %1329 = vsyncadd (!%p1097_p2), %s810_s17, 4294967232  ;;  %s1784_s13 = sadd.s32 4294967294, %s1352_s30  }
 0x1d0   : > { %s818_s20 = sand.u32 1, %s1784_s13  }
 0x1d1   : > { %s819_s26 = scalar_lea.sflag [#allocation6], %s818_s20 }
 0x1d2   : > { %1331 = dma.done.wait (!%p1097_p2), %s819_s26, 128  }
 0x1d3   : > { %1333 = vsyncadd (!%p1097_p2), %s819_s26, 4294967168  ;;  %s837_s15 = scalar_lea.sflag [#allocation9], %s818_s20 }
 0x1d4   : > { %1335 = dma.done.wait (!%p1097_p2), %s837_s15, 32  }
 0x1d5   : > { %1337 = vsyncadd (!%p1097_p2), %s837_s15, 4294967264  ;;  %p25_p6 = scmp.ge.s32.totalorder %s1435_s11, 4   ;;  %s1785_s27 = smov %s1344_s28 }
 0x1d6   : > { %s1786_s28 = smov %s1348_s29  ;;  %s1787_s29 = smov %s1447_s14 }
 0x1d7   : > { %s1788_s30 = smov %s1435_s11  ;;  %27 = sbr.rel (!%p25_p6) target bundleno = 10 (0xa), region = 178 }
 0x1de   :  { %849 = vsyncpa [#allocation4], 1 }
 0x1df   :  { %851 = vsyncpa [#allocation4 + $0x1], 1 }
 0x1e0   :  { %852 = vsyncpa [#allocation6], 1 }
 0x1e1   :  { %854 = vsyncpa [#allocation6 + $0x1], 1 }
 0x1e2   :  { %855 = vsyncpa [#allocation9], 1 }
 0x1e3   :  { %857 = vsyncpa [#allocation9 + $0x1], 1 }

</bundles_post_ra>
